<compile_context>
chip_gen: v7x
topology: tpu7x:2x2x1
jax: 0.10.0
libtpu: 0.0.40
codegen_flags: <defaults>
</compile_context>

<pallas_src>
import functools

import numpy as np
import jax
import jax.numpy as jnp
from jax.experimental import pallas as pl
from jax.experimental.pallas import tpu as pltpu

IN_DIM = 2
H1 = 128
H2 = 64
OUT_DIM = 1


def _mlp_kernel(xT_ref, w1_ref, b1_ref, w2_ref, b2_ref, w3_ref, b3_ref, out_ref,
                *, fc2_dtype):
    xT = xT_ref[...]                      # (2, TB)   lane-dense batch tile
    w1 = w1_ref[...]                      # (128, 2)  fc1 weight, PyTorch (out, in) layout

    # fc1 + ReLU (transposed): h1T[j, b] = w1[j,0]*x[b,0] + w1[j,1]*x[b,1] + b1[j]
    # K=2 contraction -> two VPU broadcast FMAs instead of a padded MXU pass.
    h1T = (w1[:, 0:1] * xT[0:1, :]
           + w1[:, 1:2] * xT[1:2, :]
           + b1_ref[...])                 # (128, TB)
    h1T = jnp.maximum(h1T, 0.0)

    # fc2 + ReLU: the one well-shaped contraction (K=128) -> MXU, f32 accumulation.
    h2T = jnp.dot(w2_ref[...].astype(fc2_dtype), h1T.astype(fc2_dtype),
                  preferred_element_type=jnp.float32) + b2_ref[...]
    h2T = jnp.maximum(h2T, 0.0)           # (64, TB)

    # fc3: single output unit -> VPU multiply + sublane reduce; the reduction over the
    # sublane axis produces the lane-dense (1, TB) output row directly.
    out_ref[...] = (jnp.sum(w3_ref[...] * h2T, axis=0, keepdims=True)
                    + b3_ref[0])          # (1, TB)


def mlp_forward(x, params, *, block_b=2048, fc2_dtype=jnp.float32):
    """Fused MLP forward pass.

    x:      (B, 2) float32
    params: PyTorch-convention tensors:
              w1 (128, 2),  b1 (128,)
              w2 (64, 128), b2 (64,)
              w3 (1, 64),   b3 (1,)
    returns (B, 1) float32

    block_b: batch rows per grid step. Big tiles amortize per-step overhead
      (~0.35 us/step); VMEM use is only ~2 KB per batch row, so tiles of several
      thousand rows fit the scoped-VMEM default on v5e/v6e/v7x. Batches larger than
      block_b get a multi-step "parallel" grid (shards across v7x's 2 TensorCores).
    fc2_dtype: operand dtype of the fc2 MXU matmul. float32 keeps the forward
      numerically faithful to the PyTorch module; jnp.bfloat16 is the single-pass
      MXU fast path if exactness is not required.
    """
    B, I = x.shape
    assert I == IN_DIM
    w1, b1, w2, b2, w3, b3 = params

    # Tile selection. A single full-batch tile needs no alignment (block == full dims);
    # multi-step tiles must be lane-aligned (multiple of 128), so pad the batch instead
    # of rejecting ragged sizes.
    if B <= block_b:
        tb, b_pad = B, B
    else:
        tb = max(128, (block_b // 128) * 128)
        b_pad = ((B + tb - 1) // tb) * tb

    xT = x.T                                          # (2, B): lane-dense input layout
    if b_pad != B:
        xT = jnp.pad(xT, ((0, 0), (0, b_pad - B)))

    out_row = pl.pallas_call(
        functools.partial(_mlp_kernel, fc2_dtype=fc2_dtype),
        out_shape=jax.ShapeDtypeStruct((1, b_pad), jnp.float32),
        grid_spec=pltpu.PrefetchScalarGridSpec(
            num_scalar_prefetch=0,
            grid=(b_pad // tb,),
            in_specs=[
                pl.BlockSpec((IN_DIM, tb), lambda i: (0, i)),        # xT batch tile
                pl.BlockSpec((H1, IN_DIM), lambda i: (0, 0)),        # w1 (grid-constant)
                pl.BlockSpec((H1, 1), lambda i: (0, 0)),             # b1 column
                pl.BlockSpec((H2, H1), lambda i: (0, 0)),            # w2
                pl.BlockSpec((H2, 1), lambda i: (0, 0)),             # b2 column
                pl.BlockSpec((H2, 1), lambda i: (0, 0)),             # w3 column
                pl.BlockSpec(memory_space=pltpu.MemorySpace.SMEM),   # b3 scalar
            ],
            out_specs=pl.BlockSpec((1, tb), lambda i: (0, i)),       # lane-dense out row
        ),
        compiler_params=pltpu.CompilerParams(dimension_semantics=("parallel",)),
    )(xT,
      w1,
      b1.reshape(H1, 1),
      w2,
      b2.reshape(H2, 1),
      w3.reshape(H2, 1),
      b3.reshape(OUT_DIM).astype(jnp.float32))

    return out_row[:, :B].reshape(B, OUT_DIM)


def mlp_ref(x, params):
    """Pure-JAX reference of the PyTorch forward (f32-exact matmuls)."""
    w1, b1, w2, b2, w3, b3 = params
    hp = jax.lax.Precision.HIGHEST
    h1 = jnp.maximum(jnp.dot(x, w1.T, precision=hp) + b1, 0.0)
    h2 = jnp.maximum(jnp.dot(h1, w2.T, precision=hp) + b2, 0.0)
    return jnp.dot(h2, w3.T, precision=hp) + b3


if __name__ == "__main__":
    B = 256  # small demo batch -> single-tile grid
    key = jax.random.PRNGKey(0)
    ks = jax.random.split(key, 7)

    # Deterministic synthetic parameters, nn.Linear-style init, PyTorch (out, in) layout.
    k1 = 1.0 / np.sqrt(IN_DIM)
    k2 = 1.0 / np.sqrt(H1)
    k3 = 1.0 / np.sqrt(H2)
    w1 = jax.random.uniform(ks[0], (H1, IN_DIM), jnp.float32, -k1, k1)
    b1 = jax.random.uniform(ks[1], (H1,), jnp.float32, -k1, k1)
    w2 = jax.random.uniform(ks[2], (H2, H1), jnp.float32, -k2, k2)
    b2 = jax.random.uniform(ks[3], (H2,), jnp.float32, -k2, k2)
    w3 = jax.random.uniform(ks[4], (OUT_DIM, H2), jnp.float32, -k3, k3)
    b3 = jax.random.uniform(ks[5], (OUT_DIM,), jnp.float32, -k3, k3)
    params = (w1, b1, w2, b2, w3, b3)

    x = jax.random.normal(ks[6], (B, IN_DIM), jnp.float32)

    out = mlp_forward(x, params)
    jax.block_until_ready(out)

    ref = mlp_ref(x, params)
    assert out.shape == (B, OUT_DIM)
    assert np.allclose(np.asarray(out), np.asarray(ref), atol=1e-4, rtol=1e-4)
    print("KERNEL_OK")
</pallas_src>

<mosaic_0001>
module attributes {stable_mosaic.version = 11 : i64} {
  func.func @_mlp_kernel(%arg0: i32, %arg1: memref<2x256xf32, #tpu.memory_space<vmem>>, %arg2: memref<128x2xf32, #tpu.memory_space<vmem>>, %arg3: memref<128x1xf32, #tpu.memory_space<vmem>>, %arg4: memref<64x128xf32, #tpu.memory_space<vmem>>, %arg5: memref<64x1xf32, #tpu.memory_space<vmem>>, %arg6: memref<64x1xf32, #tpu.memory_space<vmem>>, %arg7: memref<1xf32, #tpu.memory_space<smem>>, %arg8: memref<1x256xf32, #tpu.memory_space<vmem>>) attributes {dimension_semantics = [#tpu.dimension_semantics<parallel>], iteration_bounds = array<i64: 1>, scalar_prefetch = 0 : i64, scratch_operands = 0 : i64, tpu.core_type = #tpu.core_type<tc>, window_params = [{transform_indices = @transform_0, window_bounds = array<i64: 2, 256>}, {pipeline_mode = #tpu.pipeline_mode<synchronous>, transform_indices = @transform_1, window_bounds = array<i64: 128, 2>}, {pipeline_mode = #tpu.pipeline_mode<synchronous>, transform_indices = @transform_2, window_bounds = array<i64: 128, 1>}, {pipeline_mode = #tpu.pipeline_mode<synchronous>, transform_indices = @transform_3, window_bounds = array<i64: 64, 128>}, {pipeline_mode = #tpu.pipeline_mode<synchronous>, transform_indices = @transform_4, window_bounds = array<i64: 64, 1>}, {pipeline_mode = #tpu.pipeline_mode<synchronous>, transform_indices = @transform_5, window_bounds = array<i64: 64, 1>}, {transform_indices = @transform_6, window_bounds = array<i64: 1>}, {transform_indices = @transform_7, window_bounds = array<i64: 1, 256>}]} {
    %c0 = arith.constant 0 : index
    %c0_0 = arith.constant 0 : index
    %0 = vector.load %arg1[%c0, %c0_0] : memref<2x256xf32, #tpu.memory_space<vmem>>, vector<2x256xf32>
    %c0_1 = arith.constant 0 : index
    %c0_2 = arith.constant 0 : index
    %1 = vector.load %arg2[%c0_1, %c0_2] : memref<128x2xf32, #tpu.memory_space<vmem>>, vector<128x2xf32>
    %2 = vector.extract_strided_slice %1 {offsets = [0, 0], sizes = [128, 1], strides = [1, 1]} : vector<128x2xf32> to vector<128x1xf32>
    %3 = vector.extract_strided_slice %0 {offsets = [0, 0], sizes = [1, 256], strides = [1, 1]} : vector<2x256xf32> to vector<1x256xf32>
    %4 = vector.broadcast %2 : vector<128x1xf32> to vector<128x256xf32>
    %5 = vector.broadcast %3 : vector<1x256xf32> to vector<128x256xf32>
    %6 = arith.mulf %4, %5 : vector<128x256xf32>
    %7 = vector.extract_strided_slice %1 {offsets = [0, 1], sizes = [128, 1], strides = [1, 1]} : vector<128x2xf32> to vector<128x1xf32>
    %8 = vector.extract_strided_slice %0 {offsets = [1, 0], sizes = [1, 256], strides = [1, 1]} : vector<2x256xf32> to vector<1x256xf32>
    %9 = vector.broadcast %7 : vector<128x1xf32> to vector<128x256xf32>
    %10 = vector.broadcast %8 : vector<1x256xf32> to vector<128x256xf32>
    %11 = arith.mulf %9, %10 : vector<128x256xf32>
    %12 = arith.addf %6, %11 : vector<128x256xf32>
    %c0_3 = arith.constant 0 : index
    %c0_4 = arith.constant 0 : index
    %13 = vector.load %arg3[%c0_3, %c0_4] : memref<128x1xf32, #tpu.memory_space<vmem>>, vector<128x1xf32>
    %14 = vector.broadcast %13 : vector<128x1xf32> to vector<128x256xf32>
    %15 = arith.addf %12, %14 : vector<128x256xf32>
    %cst = arith.constant 0.000000e+00 : f32
    %16 = vector.broadcast %cst : f32 to vector<128x256xf32>
    %17 = arith.maximumf %15, %16 : vector<128x256xf32>
    %c0_5 = arith.constant 0 : index
    %c0_6 = arith.constant 0 : index
    %18 = vector.load %arg4[%c0_5, %c0_6] : memref<64x128xf32, #tpu.memory_space<vmem>>, vector<64x128xf32>
    %cst_7 = arith.constant dense<0.000000e+00> : vector<64x256xf32>
    %19 = tpu.matmul %18, %17, %cst_7 {dimension_numbers = #tpu.dot_dimension_numbers<[1], [0], [0], [1], [0, 0, 1, 1], [], []>} : vector<64x128xf32>, vector<128x256xf32>, vector<64x256xf32> -> vector<64x256xf32>
    %c0_8 = arith.constant 0 : index
    %c0_9 = arith.constant 0 : index
    %20 = vector.load %arg5[%c0_8, %c0_9] : memref<64x1xf32, #tpu.memory_space<vmem>>, vector<64x1xf32>
    %21 = vector.broadcast %20 : vector<64x1xf32> to vector<64x256xf32>
    %22 = arith.addf %19, %21 : vector<64x256xf32>
    %cst_10 = arith.constant 0.000000e+00 : f32
    %23 = vector.broadcast %cst_10 : f32 to vector<64x256xf32>
    %24 = arith.maximumf %22, %23 : vector<64x256xf32>
    %c0_11 = arith.constant 0 : index
    %c0_12 = arith.constant 0 : index
    %25 = vector.load %arg6[%c0_11, %c0_12] : memref<64x1xf32, #tpu.memory_space<vmem>>, vector<64x1xf32>
    %26 = vector.broadcast %25 : vector<64x1xf32> to vector<64x256xf32>
    %27 = arith.mulf %26, %24 : vector<64x256xf32>
    %cst_13 = arith.constant dense<0.000000e+00> : vector<256xf32>
    %28 = vector.multi_reduction <add>, %27, %cst_13 [0] : vector<64x256xf32> to vector<256xf32>
    %29 = vector.shape_cast %28 : vector<256xf32> to vector<1x256xf32>
    %c0_14 = arith.constant 0 : index
    %30 = memref.load %arg7[%c0_14] : memref<1xf32, #tpu.memory_space<smem>>
    %31 = vector.broadcast %30 : f32 to vector<1x256xf32>
    %32 = arith.addf %29, %31 : vector<1x256xf32>
    %c0_15 = arith.constant 0 : index
    %c0_16 = arith.constant 0 : index
    %33 = vector.load %arg8[%c0_15, %c0_16] : memref<1x256xf32, #tpu.memory_space<vmem>>, vector<1x256xf32>
    tpu.vector_store %arg8[%c0_15, %c0_16], %32 {strides = array<i32>} : memref<1x256xf32, #tpu.memory_space<vmem>>, vector<1x256xf32>,
    return
  }
  func.func @transform_0(%arg0: i32) -> (i32, i32) {
    %c0_i32 = arith.constant 0 : i32
    %c0_i32_0 = arith.constant 0 : i32
    return %c0_i32, %arg0 : i32, i32
  }
  func.func @transform_1(%arg0: i32) -> (i32, i32) {
    %c0_i32 = arith.constant 0 : i32
    %c0_i32_0 = arith.constant 0 : i32
    %c0_i32_1 = arith.constant 0 : i32
    return %c0_i32, %c0_i32_0 : i32, i32
  }
  func.func @transform_2(%arg0: i32) -> (i32, i32) {
    %c0_i32 = arith.constant 0 : i32
    %c0_i32_0 = arith.constant 0 : i32
    %c0_i32_1 = arith.constant 0 : i32
    return %c0_i32, %c0_i32_0 : i32, i32
  }
  func.func @transform_3(%arg0: i32) -> (i32, i32) {
    %c0_i32 = arith.constant 0 : i32
    %c0_i32_0 = arith.constant 0 : i32
    %c0_i32_1 = arith.constant 0 : i32
    return %c0_i32, %c0_i32_0 : i32, i32
  }
  func.func @transform_4(%arg0: i32) -> (i32, i32) {
    %c0_i32 = arith.constant 0 : i32
    %c0_i32_0 = arith.constant 0 : i32
    %c0_i32_1 = arith.constant 0 : i32
    return %c0_i32, %c0_i32_0 : i32, i32
  }
  func.func @transform_5(%arg0: i32) -> (i32, i32) {
    %c0_i32 = arith.constant 0 : i32
    %c0_i32_0 = arith.constant 0 : i32
    %c0_i32_1 = arith.constant 0 : i32
    return %c0_i32, %c0_i32_0 : i32, i32
  }
  func.func @transform_6(%arg0: i32) -> i32 {
    %c0_i32 = arith.constant 0 : i32
    %c0_i32_0 = arith.constant 0 : i32
    return %c0_i32 : i32
  }
  func.func @transform_7(%arg0: i32) -> (i32, i32) {
    %c0_i32 = arith.constant 0 : i32
    %c0_i32_0 = arith.constant 0 : i32
    return %c0_i32, %arg0 : i32, i32
  }
}

</mosaic_0001>

<bundles_post_ra>
// kernel: tpu_custom_call.1
= control target key start
LH: loop header
LB: loop body
LE: loop exit
PB: predicated region body
PF: predicated region fallthrough
CT: control target
= control target key end

     0   :  { %v893_v2 = vmov 1   ;;  %v894_v7 = vmov 0   ;;  %s1283_s0 = inlined_call_operand.vmem [shape: f32[2,256], index: 0, kind: input, shape index: {}]   ;;  %s1284_s1 = inlined_call_operand.vmem [shape: f32[128,2], index: 1, kind: input, shape index: {}]   ;;  %s1285_s2 = inlined_call_operand.vmem [shape: f32[128,1], index: 2, kind: input, shape index: {}]   ;;  %s1286_s3 = inlined_call_operand.vmem [shape: f32[64,128], index: 3, kind: input, shape index: {}]   ;;  %s1287_s4 = inlined_call_operand.vmem [shape: f32[64,1], index: 4, kind: input, shape index: {}]   ;;  %s1288_s5 = inlined_call_operand.vmem [shape: f32[64,1], index: 5, kind: input, shape index: {}]   ;;  %s1289_s6 = inlined_call_operand.<no memory space> [shape: f32[1], index: 6, kind: input, shape index: {}]   ;;  %s1290_s7 = inlined_call_operand.hbm [shape: f32[1,256], index: 7, kind: output, shape index: {}]  }
   0x1   :  { %v31_v0 = vld [vmem:[%s1284_s1 + $0x10] sm:$0xff]  ;;  %v29_v1 = vld [vmem:[%s1284_s1] sm:$0xff]  ;;  %853 = vset.pattern.permute.xlu0 %v893_v2  ;;  %851 = vset.pattern.permute.xlu1 %v893_v2  ;;  %v30_v4 = vld [vmem:[%s1284_s1 + $0x8] sm:$0xff] }
   0x2   :  { %185 = vperm.xlu0 %853, %v31_v0   ;;  %177 = vperm.xlu1 %851, %v29_v1   ;;  %v33_v3 = vld [vmem:[%s1284_s1 + $0x20] sm:$0xff]  ;;  %v35_v5 = vld [vmem:[%s1284_s1 + $0x30] sm:$0xff]  ;;  %v32_v6 = vld [vmem:[%s1284_s1 + $0x18] sm:$0xff] }
   0x3   :  { %v37_v8 = vld [vmem:[%s1284_s1 + $0x40] sm:$0xff] }
   0x6   :  { %193 = vperm.xlu0 %853, %v33_v3   ;;  %181 = vperm.xlu1 %851, %v30_v4  }
   0xa   :  { %201 = vperm.xlu0 %853, %v35_v5   ;;  %852 = vset.pattern.permute.xlu1 %v894_v7 }
   0xb   :  { %62 = vperm.xlu1 %852, %v32_v6  }
   0xe   :  { %209 = vperm.xlu0 %853, %v37_v8  }
   0xf   :  { %13 = vsyncpa [#allocation4], 0  ;;  %854 = vset.pattern.permute.xlu1 %v893_v2  ;;  %v39_v9 = vld [vmem:[%s1284_s1 + $0x50] sm:$0xff]  ;;  %v322_v10 = vld [vmem:[%s1285_s2] sm:$0xff]  ;;  %v126_v52 = vlaneseq  ;;  %v895_v54 = vmov 0.0   ;;  %s897_s16 = smov [#allocation3]  }
  0x10   :  { %189 = vperm.xlu1 %854, %v32_v6   ;;  %v972_v11 = vld [vmem:[%s1284_s1 + $0x60] sm:$0xff]  ;;  %v979_v12 = vld [vmem:[%s1284_s1 + $0x70] sm:$0xff]  ;;  %v34_v13 = vld [vmem:[%s1284_s1 + $0x28] sm:$0xff]  ;;  %602 = vmatprep.mubr.f32.mxu0 %v895_v54  ;;  %s790_s17 = sshll.u32 %s897_s16, 4  ;;  %s791_s17 = int_to_ptr.vmem [resolvable:$true] %s790_s17 }
  0x11   :  { %v324_v14 = vld [vmem:[%s1285_s2 + $0x10] sm:$0xff]  ;;  %v323_v15 = vld [vmem:[%s1285_s2 + $0x8] sm:$0xff]  ;;  %v325_v16 = vld [vmem:[%s1285_s2 + $0x18] sm:$0xff]  ;;  %626 = vmatprep.mubr.f32.mxu1 %v895_v54  ;;  %v1108_v56 = vshrl.u32 %v126_v52, 7  ;;  %vm781_vm0 = vcmp.lt.s32.totalorder %v126_v52, 256  ;;  %s869_s18 = scalar_lea.vmem %s791_s17, 32  ;;  %p874_p1 = scmp.lt.s32.totalorder %s791_s17, %s791_s17 }
  0x12   :  { %217 = vperm.xlu0 %853, %v39_v9   ;;  %v36_v17 = vld [vmem:[%s1284_s1 + $0x38] sm:$0xff]  ;;  %v327_v18 = vld [vmem:[%s1285_s2 + $0x28] sm:$0xff]  ;;  %v326_v20 = vld [vmem:[%s1285_s2 + $0x20] sm:$0xff]  ;;  %p870_p0 = scmp.ne.s32.totalorder %s791_s17, %s869_s18  ;;  %p875_p2 = scmp.lt.s32.totalorder %s869_s18, %s869_s18 }
  0x13   :  { %v329_v19 = vld [vmem:[%s1285_s2 + $0x38] sm:$0xff]  ;;  %v331_v21 = vld [vmem:[%s1285_s2 + $0x48] sm:$0xff]  ;;  %v490_v25 = vld [vmem:[%s1287_s4] sm:$0xff]  ;;  %v242_v60 = vsub.s32 1, %v1108_v56  ;;  %v246_v61 = vsub.s32 3, %v1108_v56  ;;  %v128_v62 = vsub.s32 0, %v1108_v56 }
  0x14   :  { %855 = vset.pattern.permute.xlu1 %v894_v7  ;;  %v333_v22 = vld [vmem:[%s1285_s2 + $0x58] sm:$0xff]  ;;  %v38_v23 = vld [vmem:[%s1284_s1 + $0x48] sm:$0xff]  ;;  %v492_v26 = vld [vmem:[%s1287_s4 + $0x10] sm:$0xff]  ;;  %v132_v63 = vsub.s32 2, %v1108_v56  ;;  %p876_p3 = por %p875_p2, %p874_p1 }
  0x15   :  { %340 = vperm.xlu1 %855, %v322_v10   ;;  %v335_v24 = vld [vmem:[%s1285_s2 + $0x68] sm:$0xff]  ;;  %v328_v27 = vld [vmem:[%s1285_s2 + $0x30] sm:$0xff]  ;;  %v667_v28 = vld [vmem:[%s1288_s5] sm:$0xff] }
  0x16   :  { %225 = vperm.xlu0 %853, %v972_v11   ;;  %v494_v29 = vld [vmem:[%s1287_s4 + $0x20] sm:$0xff]  ;;  %v40_v30 = vld [vmem:[%s1284_s1 + $0x58] sm:$0xff]  ;;  %v495_v31 = vld [vmem:[%s1287_s4 + $0x28] sm:$0xff]  ;;  %p877_p4 = pnand %p876_p3, %p870_p0 }
  0x17   :  { %v496_v32 = vld [vmem:[%s1287_s4 + $0x30] sm:$0xff]  ;;  %v330_v33 = vld [vmem:[%s1285_s2 + $0x40] sm:$0xff]  ;;  %v497_v34 = vld [vmem:[%s1287_s4 + $0x38] sm:$0xff] }
  0x18   :  { %v673_v35 = vld [vmem:[%s1288_s5 + $0x30] sm:$0xff]  ;;  %v42_v36 = vld [vmem:[%s1284_s1 + $0x68] sm:$0xff]  ;;  %v44_v38 = vld [vmem:[%s1284_s1 + $0x78] sm:$0xff] }
  0x19   :  { %67 = vperm.xlu1 %855, %v33_v3   ;;  %v332_v37 = vld [vmem:[%s1285_s2 + $0x50] sm:$0xff]  ;;  %v334_v39 = vld [vmem:[%s1285_s2 + $0x60] sm:$0xff]  ;;  %v337_v45 = vld [vmem:[%s1285_s2 + $0x78] sm:$0xff] }
  0x1a   :  { %233 = vperm.xlu0 %853, %v979_v12   ;;  %v336_v42 = vld [vmem:[%s1285_s2 + $0x70] sm:$0xff]  ;;  %v491_v48 = vld [vmem:[%s1287_s4 + $0x8] sm:$0xff]  ;;  %v493_v50 = vld [vmem:[%s1287_s4 + $0x18] sm:$0xff] }
  0x1b   :  { %v668_v55 = vld [vmem:[%s1288_s5 + $0x8] sm:$0xff]  ;;  %v669_v59 = vld [vmem:[%s1288_s5 + $0x10] sm:$0xff]  ;;  %v670_v3 = vld [vmem:[%s1288_s5 + $0x18] sm:$0xff] }
  0x1c   :  { %v671_v10 = vld [vmem:[%s1288_s5 + $0x20] sm:$0xff] }
  0x1d   :  { %72 = vperm.xlu1 %855, %v34_v13  }
  0x1e   :  { %866 = vset.pattern.permute.xlu0 %v894_v7 }
  0x1f   :  { %47 = vperm.xlu0 %866, %v29_v1   ;;  %v28_v1 = vld [vmem:[%s1283_s0] sm:$0xf] }
  0x20   :  { %v129_v6 = vrot.slane %v28_v1, %v128_v62 }
  0x21   :  { %856 = vset.pattern.permute.xlu1 %v893_v2 }
  0x22   :  { %197 = vperm.xlu1 %856, %v34_v13   ;;  %v1138_v13 = vrot.slane %v129_v6, %v128_v62 }
  0x23   :  { %52 = vperm.xlu0 %866, %v30_v4   ;;  %v243_v4 = vrot.slane %v28_v1, %v242_v60 }
  0x26   :  { %857 = vset.pattern.permute.xlu1 %v894_v7 }
  0x27   :  { %57 = vperm.xlu0 %866, %v31_v0   ;;  %350 = vperm.xlu1 %857, %v324_v14  }
  0x2b   :  { %345 = vperm.xlu0 %866, %v323_v15   ;;  %77 = vperm.xlu1 %857, %v35_v5   ;;  %v247_v5 = vrot.slane %v28_v1, %v246_v61 }
  0x2f   :  { %355 = vperm.xlu0 %866, %v325_v16   ;;  %82 = vperm.xlu1 %857, %v36_v17  }
  0x33   :  { %365 = vperm.xlu0 %866, %v327_v18   ;;  %858 = vset.pattern.permute.xlu1 %v893_v2 }
  0x34   :  { %205 = vperm.xlu1 %858, %v36_v17  }
  0x37   :  { %375 = vperm.xlu0 %866, %v329_v19   ;;  %v672_v19 = vld [vmem:[%s1288_s5 + $0x28] sm:$0xff] }
  0x38   :  { %859 = vset.pattern.permute.xlu1 %v894_v7 }
  0x39   :  { %360 = vperm.xlu1 %859, %v326_v20  }
  0x3b   :  { %385 = vperm.xlu0 %866, %v331_v21  }
  0x3d   :  { %87 = vperm.xlu1 %859, %v37_v8  }
  0x3f   :  { %395 = vperm.xlu0 %866, %v333_v22  }
  0x41   :  { %92 = vperm.xlu1 %859, %v38_v23  }
  0x43   :  { %405 = vperm.xlu0 %866, %v335_v24  }
  0x45   :  { %860 = vset.pattern.permute.xlu1 %v893_v2 }
  0x46   :  { %213 = vperm.xlu1 %860, %v38_v23  }
  0x47   :  { %500 = vperm.xlu0 %866, %v490_v25  }
  0x4a   :  { %861 = vset.pattern.permute.xlu1 %v894_v7 }
  0x4b   :  { %510 = vperm.xlu0 %866, %v492_v26   ;;  %370 = vperm.xlu1 %861, %v328_v27  }
  0x4f   :  { %677 = vperm.xlu0 %866, %v667_v28   ;;  %97 = vperm.xlu1 %861, %v39_v9  }
  0x53   :  { %520 = vperm.xlu0 %866, %v494_v29   ;;  %102 = vperm.xlu1 %861, %v40_v30  }
  0x57   :  { %525 = vperm.xlu0 %866, %v495_v31   ;;  %862 = vset.pattern.permute.xlu1 %v893_v2 }
  0x58   :  { %221 = vperm.xlu1 %862, %v40_v30   ;;  %v674_v30 = vld [vmem:[%s1288_s5 + $0x38] sm:$0xff] }
  0x5b   :  { %530 = vperm.xlu0 %866, %v496_v32  }
  0x5c   :  { %863 = vset.pattern.permute.xlu1 %v894_v7 }
  0x5d   :  { %380 = vperm.xlu1 %863, %v330_v33  }
  0x5f   :  { %535 = vperm.xlu0 %866, %v497_v34  }
  0x61   :  { %107 = vperm.xlu1 %863, %v972_v11   ;;  %v1134_v11 = vrot.slane %v243_v4, %v242_v60 }
  0x63   :  { %707 = vperm.xlu0 %866, %v673_v35  }
  0x65   :  { %112 = vperm.xlu1 %863, %v42_v36  }
  0x69   :  { %864 = vset.pattern.permute.xlu1 %v893_v2 }
  0x6a   :  { %229 = vperm.xlu1 %864, %v42_v36  }
  0x6e   :  { %865 = vset.pattern.permute.xlu1 %v894_v7 }
  0x6f   :  { %390 = vperm.xlu1 %865, %v332_v37  }
  0x73   :  { %117 = vperm.xlu1 %865, %v979_v12   ;;  %v1136_v12 = vrot.slane %v247_v5, %v242_v60 }
  0x77   :  { %122 = vperm.xlu1 %865, %v44_v38  }
  0x7b   :  { %867 = vset.pattern.permute.xlu1 %v893_v2 }
  0x7c   :  { %237 = vperm.xlu1 %867, %v44_v38  }
  0x80   :  { %868 = vset.pattern.permute.xlu1 %v894_v7  ;;  %v133_v7 = vrot.slane %v28_v1, %v132_v63 }
  0x81   :  { %400 = vperm.xlu1 %868, %v334_v39   ;;  %v178_v40 = vpop.permute.xlu1 %177  ;;  %v186_v41 = vpop.permute.xlu0 %185 }
  0x82   :  { %v1140_v14 = vrot.slane %v133_v7, %v128_v62  ;;  %v258_v20 = vmul.f32 %v1134_v11, %v178_v40  ;;  %v259_v21 = vmul.f32 %v1136_v12, %v178_v40  ;;  %v263_v22 = vmul.f32 %v1136_v12, %v186_v41 }
  0x83   :  { %v262_v25 = vmul.f32 %v1134_v11, %v186_v41 }
  0x85   :  { %410 = vperm.xlu1 %868, %v336_v42   ;;  %v1081_v43 = vpop.permute.xlu1 %181  ;;  %v1083_v44 = vpop.permute.xlu0 %193 }
  0x86   :  { %v260_v31 = vmul.f32 %v1134_v11, %v1081_v43  ;;  %v261_v32 = vmul.f32 %v1136_v12, %v1081_v43 }
  0x89   :  { %415 = vperm.xlu1 %868, %v337_v45   ;;  %v1088_v46 = vpop.permute.xlu0 %201 }
  0x8a   :  { %v1090_v47 = vpop.permute.xlu1 %62 }
  0x8b   :  { %v150_v40 = vmul.f32 %v1138_v13, %v1090_v47 }
  0x8d   :  { %505 = vperm.xlu1 %868, %v491_v48   ;;  %v1095_v49 = vpop.permute.xlu0 %209 }
  0x8f   :  { %v190_v51 = vpop.permute.xlu1 %189 }
  0x90   :  { %v264_v35 = vmul.f32 %v1134_v11, %v190_v51  ;;  %v265_v36 = vmul.f32 %v1136_v12, %v190_v51 }
  0x91   :  { %515 = vperm.xlu1 %868, %v493_v50   ;;  %v1100_v53 = vpop.permute.xlu0 %217  ;;  %v151_v50 = vmul.f32 %v1140_v14, %v1090_v47 }
  0x92   :  { %v296_v60 = vadd.f32 %v264_v35, %v150_v40 }
  0x93   :  { %v297_v63 = vadd.f32 %v265_v36, %v151_v50 }
  0x94   :  { %v341_v57 = vpop.permute.xlu1 %340 }
  0x95   :  { %682 = vperm.xlu1 %868, %v668_v55   ;;  %v1110_v58 = vpop.permute.xlu0 %225 }
  0x98   :  { %v1119_v0 = vpop.permute.xlu1 %67 }
  0x99   :  { %687 = vperm.xlu1 %868, %v669_v59   ;;  %v1124_v2 = vpop.permute.xlu0 %233 }
  0x9c   :  { %v1129_v8 = vpop.permute.xlu1 %72 }
  0x9d   :  { %692 = vperm.xlu1 %868, %v670_v3  }
  0x9e   :  { %v48_v9 = vpop.permute.xlu0 %47 }
  0x9f   :  { %v144_v16 = vmul.f32 %v1138_v13, %v48_v9  ;;  %v145_v17 = vmul.f32 %v1140_v14, %v48_v9 }
  0xa1   :  { %697 = vperm.xlu1 %868, %v671_v10   ;;  %v198_v15 = vpop.permute.xlu1 %197  ;;  %v290_v26 = vadd.f32 %v258_v20, %v144_v16  ;;  %v291_v27 = vadd.f32 %v259_v21, %v145_v17  ;;  %v267_v21 = vmul.f32 %v1136_v12, %v1083_v44 }
  0xa2   :  { %v53_v18 = vpop.permute.xlu0 %52  ;;  %v268_v10 = vmul.f32 %v1134_v11, %v198_v15  ;;  %v269_v17 = vmul.f32 %v1136_v12, %v198_v15  ;;  %v155_v15 = vmul.f32 %v1140_v14, %v1129_v8 }
  0xa3   :  { %v146_v23 = vmul.f32 %v1138_v13, %v53_v18  ;;  %v147_v24 = vmul.f32 %v1140_v14, %v53_v18  ;;  %v419_v43 = vadd.f32 %v341_v57, %v291_v27  ;;  %v418_v48 = vadd.f32 %v341_v57, %v290_v26 }
  0xa4   :  { %v266_v57 = vmul.f32 %v1134_v11, %v1083_v44 }
  0xa5   :  { %702 = vperm.xlu1 %868, %v672_v19   ;;  %v292_v38 = vadd.f32 %v260_v31, %v146_v23  ;;  %v293_v39 = vadd.f32 %v261_v32, %v147_v24  ;;  %v451_v5 = vmax.f32 %v419_v43, 0.0  ;;  %v450_v6 = vmax.f32 %v418_v48, 0.0 }
  0xa6   :  { %v58_v28 = vpop.permute.xlu0 %57  ;;  %v351_v29 = vpop.permute.xlu1 %350  ;;  %v153_v23 = vmul.f32 %v1140_v14, %v1119_v0 }
  0xa7   :  { %v148_v33 = vmul.f32 %v1138_v13, %v58_v28  ;;  %v149_v34 = vmul.f32 %v1140_v14, %v58_v28 }
  0xa9   :  { %v295_v37 = vadd.f32 %v263_v22, %v149_v34  ;;  %712 = vperm.xlu1 %868, %v674_v30   ;;  %v294_v41 = vadd.f32 %v262_v25, %v148_v33  ;;  %v152_v22 = vmul.f32 %v1138_v13, %v1119_v0  ;;  %v154_v25 = vmul.f32 %v1138_v13, %v1129_v8 }
  0xaa   :  { %v346_v42 = vpop.permute.xlu0 %345  ;;  %v1166_v45 = vpop.permute.xlu1 %77  ;;  %v301_v30 = vadd.f32 %v269_v17, %v155_v15  ;;  %v299_v33 = vadd.f32 %v267_v21, %v153_v23  ;;  %v274_v15 = vmul.f32 %v1134_v11, %v1095_v49 }
  0xab   :  { %v420_v55 = vadd.f32 %v346_v42, %v292_v38  ;;  %v421_v59 = vadd.f32 %v346_v42, %v293_v39  ;;  %v423_v51 = vadd.f32 %v351_v29, %v295_v37  ;;  %v422_v1 = vadd.f32 %v351_v29, %v294_v41 }
  0xac   :  { %v300_v29 = vadd.f32 %v268_v10, %v154_v25  ;;  %v298_v0 = vadd.f32 %v266_v57, %v152_v22 }
  0xad   :  { %v452_v61 = vmax.f32 %v420_v55, 0.0  ;;  %v453_v62 = vmax.f32 %v421_v59, 0.0  ;;  %v455_v18 = vmax.f32 %v423_v51, 0.0  ;;  %v454_v24 = vmax.f32 %v422_v1, 0.0 }
  0xae   :  { %v356_v3 = vpop.permute.xlu0 %355  ;;  %v83_v4 = vpop.permute.xlu1 %82  ;;  %v271_v51 = vmul.f32 %v1136_v12, %v1088_v46 }
  0xaf   :  { %v424_v7 = vadd.f32 %v356_v3, %v296_v60  ;;  %v425_v9 = vadd.f32 %v356_v3, %v297_v63  ;;  %v798_v47 = vpack.c.bf16 %v453_v62, %v451_v5  ;;  %v800_v16 = vpack.c.bf16 %v452_v61, %v450_v6 }
  0xb0   :  { %v158_v55 = vmul.f32 %v1138_v13, %v83_v4  ;;  %v159_v59 = vmul.f32 %v1140_v14, %v83_v4  ;;  %v270_v60 = vmul.f32 %v1134_v11, %v1088_v46  ;;  %v156_v61 = vmul.f32 %v1138_v13, %v1166_v45 }
  0xb1   :  { %v456_v19 = vmax.f32 %v424_v7, 0.0  ;;  %v457_v20 = vmax.f32 %v425_v9, 0.0  ;;  %799 = vmatprep.subr.bf16.mxu0 %v798_v47  ;;  %830 = vmatprep.subr.bf16.mxu1 %v798_v47  ;;  %v157_v62 = vmul.f32 %v1140_v14, %v1166_v45 }
  0xb2   :  { %801 = vmatpush1.bf16.msra.mxu0 %v800_v16  ;;  %838 = vmatpush1.bf16.msra.mxu1 %v800_v16  ;;  %v366_v44 = vpop.permute.xlu0 %365  ;;  %v302_v9 = vadd.f32 %v270_v60, %v156_v61 }
  0xb3   :  { %v206_v26 = vpop.permute.xlu1 %205  ;;  %v802_v27 = vpack.c.bf16 %v457_v20, %v455_v18  ;;  %v804_v28 = vpack.c.bf16 %v456_v19, %v454_v24  ;;  %v428_v31 = vadd.f32 %v366_v44, %v300_v29  ;;  %v429_v32 = vadd.f32 %v366_v44, %v301_v30 }
  0xb4   :  { %v272_v48 = vmul.f32 %v1134_v11, %v206_v26  ;;  %v273_v50 = vmul.f32 %v1136_v12, %v206_v26  ;;  %v303_v4 = vadd.f32 %v271_v51, %v157_v62  ;;  %v275_v26 = vmul.f32 %v1136_v12, %v1095_v49 }
  0xb5   :  { %803 = vmatprep.subr.bf16.mxu0 %v802_v27  ;;  %831 = vmatprep.subr.bf16.mxu1 %v802_v27  ;;  %v460_v8 = vmax.f32 %v428_v31, 0.0  ;;  %v461_v37 = vmax.f32 %v429_v32, 0.0 }
  0xb6   :  { %805 = vmatpush1.bf16.msra.mxu0 %v804_v28  ;;  %839 = vmatpush1.bf16.msra.mxu1 %v804_v28  ;;  %v304_v63 = vadd.f32 %v272_v48, %v158_v55  ;;  %v305_v1 = vadd.f32 %v273_v50, %v159_v59  ;;  %v376_v5 = vpop.permute.xlu0 %375 }
  0xb8   :  { %v361_v34 = vpop.permute.xlu1 %360  ;;  %v432_v6 = vadd.f32 %v376_v5, %v304_v63  ;;  %v433_v7 = vadd.f32 %v376_v5, %v305_v1  ;;  %v278_v1 = vmul.f32 %v1134_v11, %v1100_v53 }
  0xb9   :  { %v426_v35 = vadd.f32 %v361_v34, %v298_v0  ;;  %v427_v36 = vadd.f32 %v361_v34, %v299_v33 }
  0xba   :  { %v464_v16 = vmax.f32 %v432_v6, 0.0  ;;  %v465_v17 = vmax.f32 %v433_v7, 0.0  ;;  %v386_v0 = vpop.permute.xlu0 %385 }
  0xbb   :  { %v458_v38 = vmax.f32 %v426_v35, 0.0  ;;  %v459_v39 = vmax.f32 %v427_v36, 0.0 }
  0xbc   :  { %v88_v40 = vpop.permute.xlu1 %87 }
  0xbd   :  { %v806_v41 = vpack.c.bf16 %v461_v37, %v459_v39  ;;  %v808_v42 = vpack.c.bf16 %v460_v8, %v458_v38  ;;  %v160_v27 = vmul.f32 %v1138_v13, %v88_v40  ;;  %v161_v44 = vmul.f32 %v1140_v14, %v88_v40 }
  0xbe   :  { %v396_v5 = vpop.permute.xlu0 %395 }
  0xbf   :  { %807 = vmatprep.subr.bf16.mxu0 %v806_v41  ;;  %832 = vmatprep.subr.bf16.mxu1 %v806_v41  ;;  %v306_v33 = vadd.f32 %v274_v15, %v160_v27  ;;  %v307_v34 = vadd.f32 %v275_v26, %v161_v44 }
  0xc0   :  { %v93_v43 = vpop.permute.xlu1 %92  ;;  %809 = vmatpush1.bf16.msra.mxu0 %v808_v42  ;;  %840 = vmatpush1.bf16.msra.mxu1 %v808_v42 }
  0xc1   :  { %v162_v24 = vmul.f32 %v1138_v13, %v93_v43  ;;  %v163_v25 = vmul.f32 %v1140_v14, %v93_v43 }
  0xc5   :  { %v214_v3 = vpop.permute.xlu1 %213 }
  0xc6   :  { %v276_v22 = vmul.f32 %v1134_v11, %v214_v3  ;;  %v277_v23 = vmul.f32 %v1136_v12, %v214_v3  ;;  %v279_v3 = vmul.f32 %v1136_v12, %v1100_v53 }
  0xc8   :  { %v308_v28 = vadd.f32 %v276_v22, %v162_v24  ;;  %v309_v29 = vadd.f32 %v277_v23, %v163_v25 }
  0xca   :  { %v371_v57 = vpop.permute.xlu1 %370  ;;  %v436_v31 = vadd.f32 %v386_v0, %v308_v28  ;;  %v437_v32 = vadd.f32 %v386_v0, %v309_v29  ;;  %v282_v28 = vmul.f32 %v1134_v11, %v1110_v58  ;;  %v283_v29 = vmul.f32 %v1136_v12, %v1110_v58 }
  0xcb   :  { %v430_v10 = vadd.f32 %v371_v57, %v302_v9  ;;  %v431_v47 = vadd.f32 %v371_v57, %v303_v4 }
  0xcc   :  { %v469_v39 = vmax.f32 %v437_v32, 0.0  ;;  %v468_v41 = vmax.f32 %v436_v31, 0.0 }
  0xcd   :  { %v462_v46 = vmax.f32 %v430_v10, 0.0  ;;  %v463_v18 = vmax.f32 %v431_v47, 0.0 }
  0xce   :  { %v98_v19 = vpop.permute.xlu1 %97 }
  0xcf   :  { %v810_v20 = vpack.c.bf16 %v465_v17, %v463_v18  ;;  %v812_v21 = vpack.c.bf16 %v464_v16, %v462_v46  ;;  %v164_v60 = vmul.f32 %v1138_v13, %v98_v19  ;;  %v165_v51 = vmul.f32 %v1140_v14, %v98_v19 }
  0xd1   :  { %811 = vmatprep.subr.bf16.mxu0 %v810_v20  ;;  %833 = vmatprep.subr.bf16.mxu1 %v810_v20  ;;  %v310_v9 = vadd.f32 %v278_v1, %v164_v60  ;;  %v311_v4 = vadd.f32 %v279_v3, %v165_v51 }
  0xd2   :  { %v103_v45 = vpop.permute.xlu1 %102  ;;  %813 = vmatpush1.bf16.msra.mxu0 %v812_v21  ;;  %841 = vmatpush1.bf16.msra.mxu1 %v812_v21 }
  0xd3   :  { %v166_v55 = vmul.f32 %v1138_v13, %v103_v45  ;;  %v167_v59 = vmul.f32 %v1140_v14, %v103_v45 }
  0xd7   :  { %v222_v30 = vpop.permute.xlu1 %221 }
  0xd8   :  { %v280_v48 = vmul.f32 %v1134_v11, %v222_v30  ;;  %v281_v50 = vmul.f32 %v1136_v12, %v222_v30  ;;  %v406_v30 = vpop.permute.xlu0 %405 }
  0xda   :  { %v312_v61 = vadd.f32 %v280_v48, %v166_v55  ;;  %v313_v62 = vadd.f32 %v281_v50, %v167_v59 }
  0xdc   :  { %v381_v35 = vpop.permute.xlu1 %380  ;;  %v440_v6 = vadd.f32 %v396_v5, %v312_v61  ;;  %v441_v7 = vadd.f32 %v396_v5, %v313_v62 }
  0xdd   :  { %v434_v36 = vadd.f32 %v381_v35, %v306_v33  ;;  %v435_v8 = vadd.f32 %v381_v35, %v307_v34 }
  0xde   :  { %v473_v46 = vmax.f32 %v441_v7, 0.0  ;;  %v472_v18 = vmax.f32 %v440_v6, 0.0 }
  0xdf   :  { %v466_v37 = vmax.f32 %v434_v36, 0.0  ;;  %v467_v38 = vmax.f32 %v435_v8, 0.0 }
  0xe0   :  { %v108_v49 = vpop.permute.xlu1 %107 }
  0xe1   :  { %v814_v42 = vpack.c.bf16 %v469_v39, %v467_v38  ;;  %v816_v43 = vpack.c.bf16 %v468_v41, %v466_v37  ;;  %v168_v15 = vmul.f32 %v1138_v13, %v108_v49  ;;  %v169_v26 = vmul.f32 %v1140_v14, %v108_v49 }
  0xe2   :  { %v286_v38 = vmul.f32 %v1134_v11, %v1124_v2  ;;  %v287_v39 = vmul.f32 %v1136_v12, %v1124_v2 }
  0xe3   :  { %815 = vmatprep.subr.bf16.mxu0 %v814_v42  ;;  %834 = vmatprep.subr.bf16.mxu1 %v814_v42  ;;  %v314_v32 = vadd.f32 %v282_v28, %v168_v15  ;;  %v315_v33 = vadd.f32 %v283_v29, %v169_v26 }
  0xe4   :  { %v113_v40 = vpop.permute.xlu1 %112  ;;  %817 = vmatpush1.bf16.msra.mxu0 %v816_v43  ;;  %842 = vmatpush1.bf16.msra.mxu1 %v816_v43 }
  0xe5   :  { %v171_v23 = vmul.f32 %v1140_v14, %v113_v40  ;;  %v170_v24 = vmul.f32 %v1138_v13, %v113_v40 }
  0xe9   :  { %v230_v63 = vpop.permute.xlu1 %229 }
  0xea   :  { %v285_v45 = vmul.f32 %v1136_v12, %v230_v63  ;;  %v284_v22 = vmul.f32 %v1134_v11, %v230_v63 }
  0xec   :  { %v317_v25 = vadd.f32 %v285_v45, %v171_v23  ;;  %v316_v27 = vadd.f32 %v284_v22, %v170_v24 }
  0xee   :  { %v391_v57 = vpop.permute.xlu1 %390  ;;  %v445_v0 = vadd.f32 %v406_v30, %v317_v25  ;;  %v444_v31 = vadd.f32 %v406_v30, %v316_v27 }
  0xef   :  { %v438_v10 = vadd.f32 %v391_v57, %v310_v9  ;;  %v439_v47 = vadd.f32 %v391_v57, %v311_v4  ;;  %v482_v4 = vld [vmem:[%s1286_s3] sm:$0xff] }
  0xf0   :  { %v477_v41 = vmax.f32 %v445_v0, 0.0  ;;  %v476_v40 = vmax.f32 %v444_v31, 0.0  ;;  %v486_v57 = vld [vmem:[%s1286_s3 + $0x20] sm:$0xff] }
  0xf1   :  { %v470_v16 = vmax.f32 %v438_v10, 0.0  ;;  %v471_v17 = vmax.f32 %v439_v47, 0.0  ;;  %v483_v10 = vld [vmem:[%s1286_s3 + $0x8] sm:$0xff] }
  0xf2   :  { %v118_v19 = vpop.permute.xlu1 %117  ;;  %v487_v47 = vld [vmem:[%s1286_s3 + $0x28] sm:$0xff] }
  0xf3   :  { %v818_v20 = vpack.c.bf16 %v473_v46, %v471_v17  ;;  %v820_v21 = vpack.c.bf16 %v472_v18, %v470_v16  ;;  %v172_v34 = vmul.f32 %v1138_v13, %v118_v19  ;;  %v173_v36 = vmul.f32 %v1140_v14, %v118_v19  ;;  %v484_v16 = vld [vmem:[%s1286_s3 + $0x10] sm:$0xff]  ;;  %v485_v46 = vld [vmem:[%s1286_s3 + $0x18] sm:$0xff]  ;;  %v501_v19 = vpop.permute.xlu0 %500 }
  0xf4   :  { %v488_v17 = vld [vmem:[%s1286_s3 + $0x30] sm:$0xff]  ;;  %v489_v18 = vld [vmem:[%s1286_s3 + $0x38] sm:$0xff] }
  0xf5   :  { %819 = vmatprep.subr.bf16.mxu0 %v818_v20  ;;  %835 = vmatprep.subr.bf16.mxu1 %v818_v20  ;;  %v318_v55 = vadd.f32 %v286_v38, %v172_v34  ;;  %v319_v60 = vadd.f32 %v287_v39, %v173_v36 }
  0xf6   :  { %v123_v53 = vpop.permute.xlu1 %122  ;;  %821 = vmatpush1.bf16.msra.mxu0 %v820_v21  ;;  %843 = vmatpush1.bf16.msra.mxu1 %v820_v21 }
  0xf7   :  { %v174_v48 = vmul.f32 %v1138_v13, %v123_v53  ;;  %v175_v59 = vmul.f32 %v1140_v14, %v123_v53  ;;  %v511_v21 = vpop.permute.xlu0 %510 }
  0xfb   :  { %v238_v44 = vpop.permute.xlu1 %237  ;;  %v678_v53 = vpop.permute.xlu0 %677 }
  0xfc   :  { %v288_v58 = vmul.f32 %v1134_v11, %v238_v44  ;;  %v289_v49 = vmul.f32 %v1136_v12, %v238_v44 }
  0xfe   :  { %v320_v62 = vadd.f32 %v288_v58, %v174_v48  ;;  %v321_v11 = vadd.f32 %v289_v49, %v175_v59 }
  0xff   :  { %v521_v23 = vpop.permute.xlu0 %520 }
 0x100   :  { %v401_v35 = vpop.permute.xlu1 %400 }
 0x101   :  { %v442_v8 = vadd.f32 %v401_v35, %v314_v32  ;;  %v443_v37 = vadd.f32 %v401_v35, %v315_v33 }
 0x103   :  { %v474_v42 = vmax.f32 %v442_v8, 0.0  ;;  %v475_v43 = vmax.f32 %v443_v37, 0.0  ;;  %v526_v28 = vpop.permute.xlu0 %525 }
 0x104   :  { %v411_v50 = vpop.permute.xlu1 %410 }
 0x105   :  { %v822_v51 = vpack.c.bf16 %v477_v41, %v475_v43  ;;  %v824_v61 = vpack.c.bf16 %v476_v40, %v474_v42  ;;  %v446_v63 = vadd.f32 %v411_v50, %v318_v55  ;;  %v447_v2 = vadd.f32 %v411_v50, %v319_v60 }
 0x107   :  { %823 = vmatprep.subr.bf16.mxu0 %v822_v51  ;;  %836 = vmatprep.subr.bf16.mxu1 %v822_v51  ;;  %v478_v5 = vmax.f32 %v446_v63, 0.0  ;;  %v479_v13 = vmax.f32 %v447_v2, 0.0  ;;  %v531_v40 = vpop.permute.xlu0 %530 }
 0x108   :  { %v416_v1 = vpop.permute.xlu1 %415  ;;  %825 = vmatpush1.bf16.msra.mxu0 %v824_v61  ;;  %844 = vmatpush1.bf16.msra.mxu1 %v824_v61 }
 0x109   :  { %v448_v12 = vadd.f32 %v416_v1, %v320_v62  ;;  %v449_v3 = vadd.f32 %v416_v1, %v321_v11 }
 0x10b   :  { %v480_v6 = vmax.f32 %v448_v12, 0.0  ;;  %v481_v7 = vmax.f32 %v449_v3, 0.0 }
 0x10c   :  { %v506_v20 = vpop.permute.xlu1 %505 }
 0x10d   :  { %v826_v9 = vpack.c.bf16 %v481_v7, %v479_v13  ;;  %v828_v14 = vpack.c.bf16 %v480_v6, %v478_v5 }
 0x10f   :  { %827 = vmatprep.subr.bf16.mxu0 %v826_v9  ;;  %837 = vmatprep.subr.bf16.mxu1 %v826_v9 }
 0x110   :  { %829 = vmatpush1.bf16.msra.mxu0 %v828_v14  ;;  %845 = vmatpush1.bf16.msra.mxu1 %v828_v14  ;;  %v516_v45 = vpop.permute.xlu1 %515 }
 0x113   :  { %603 = vmatmul.mubr.f32.vlgmr.msra.gmra.mrb[0].mxu0 %v482_v4  ;;  %627 = vmatmul.mubr.f32.vlgmr.msra.gmra.mrb[0].mxu1 %v486_v57 }
 0x114   :  { %608 = vmatprep.mubr.f32.mxu0 %v895_v54  ;;  %632 = vmatprep.mubr.f32.mxu1 %v895_v54  ;;  %v683_v22 = vpop.permute.xlu1 %682 }
 0x117   :  { %609 = vmatmul.mubr.f32.gmra.mrb[2].mxu0 %v483_v10  ;;  %633 = vmatmul.mubr.f32.gmra.mrb[2].mxu1 %v487_v47 }
 0x118   :  { %614 = vmatprep.mubr.f32.mxu0 %v895_v54  ;;  %638 = vmatprep.mubr.f32.mxu1 %v895_v54  ;;  %v688_v24 = vpop.permute.xlu1 %687 }
 0x11b   :  { %615 = vmatmul.mubr.f32.gmra.mrb[4].mxu0 %v484_v16  ;;  %639 = vmatmul.mubr.f32.gmra.mrb[4].mxu1 %v488_v17  ;;  %v536_v16 = vpop.permute.xlu0 %535 }
 0x11c   :  { %620 = vmatprep.mubr.f32.mxu0 %v895_v54  ;;  %644 = vmatprep.mubr.f32.mxu1 %v895_v54  ;;  %v693_v29 = vpop.permute.xlu1 %692 }
 0x11f   :  { %621 = vmatmul.mubr.f32.gmra.mrb[6].mxu0 %v485_v46  ;;  %645 = vmatmul.mubr.f32.gmra.mrb[6].mxu1 %v489_v18 }
 0x120   :  { %v698_v59 = vpop.permute.xlu1 %697 }
 0x1e6   :  { %v604_v25 = vpop.f32.mrb[0].mxu0  ;;  %v628_v54 = vpop.f32.mrb[0].mxu1 }
 0x1e7   :  { %v605_v15 = vadd.f32 %v604_v25, %v501_v19  ;;  %v606_v26 = vpop.f32.mrb[1].mxu0  ;;  %v630_v27 = vpop.f32.mrb[1].mxu1  ;;  %v629_v60 = vadd.f32 %v628_v54, %v521_v23 }
 0x1e8   :  { %v607_v44 = vadd.f32 %v606_v26, %v501_v19  ;;  %v631_v62 = vadd.f32 %v630_v27, %v521_v23 }
 0x1e9   :  { %v651_v31 = vmax.f32 %v605_v15, 0.0  ;;  %v659_v4 = vmax.f32 %v629_v60, 0.0  ;;  %v896_v60 = vmov 1966171168  }
 0x1ea   :  { %v610_v30 = vpop.f32.mrb[2].mxu0  ;;  %v634_v0 = vpop.f32.mrb[2].mxu1  ;;  %v652_v35 = vmax.f32 %v607_v44, 0.0  ;;  %v660_v17 = vmax.f32 %v631_v62, 0.0 }
 0x1eb   :  { %v611_v32 = vadd.f32 %v610_v30, %v506_v20  ;;  %v612_v33 = vpop.f32.mrb[3].mxu0  ;;  %v636_v34 = vpop.f32.mrb[3].mxu1  ;;  %v715_v58 = vmul.f32 %v678_v53, %v651_v31  ;;  %v635_v12 = vadd.f32 %v634_v0, %v526_v28  ;;  %v723_v15 = vmul.f32 %v698_v59, %v659_v4 }
 0x1ec   :  { %v613_v36 = vadd.f32 %v612_v33, %v506_v20  ;;  %v716_v48 = vmul.f32 %v678_v53, %v652_v35  ;;  %v637_v7 = vadd.f32 %v636_v34, %v526_v28  ;;  %v708_v31 = vpop.permute.xlu0 %707 }
 0x1ed   :  { %v653_v8 = vmax.f32 %v611_v32, 0.0  ;;  %v661_v20 = vmax.f32 %v635_v12, 0.0 }
 0x1ee   :  { %v654_v37 = vmax.f32 %v613_v36, 0.0  ;;  %v616_v38 = vpop.f32.mrb[4].mxu0  ;;  %v640_v39 = vpop.f32.mrb[4].mxu1  ;;  %v662_v23 = vmax.f32 %v637_v7, 0.0 }
 0x1ef   :  { %v717_v41 = vmul.f32 %v683_v22, %v653_v8  ;;  %v617_v49 = vadd.f32 %v616_v38, %v511_v21  ;;  %v618_v42 = vpop.f32.mrb[5].mxu0  ;;  %v642_v43 = vpop.f32.mrb[5].mxu1  ;;  %v641_v10 = vadd.f32 %v640_v39, %v531_v40 }
 0x1f0   :  { %v718_v50 = vmul.f32 %v683_v22, %v654_v37  ;;  %v619_v55 = vadd.f32 %v618_v42, %v511_v21  ;;  %v643_v18 = vadd.f32 %v642_v43, %v531_v40  ;;  %v703_v22 = vpop.permute.xlu1 %702 }
 0x1f1   :  { %v731_v51 = vadd.f32 %v717_v41, %v715_v58  ;;  %v655_v61 = vmax.f32 %v617_v49, 0.0  ;;  %v663_v26 = vmax.f32 %v641_v10, 0.0  ;;  %v725_v28 = vmul.f32 %v703_v22, %v661_v20 }
 0x1f2   :  { %v744_v63 = vadd.f32 %v718_v50, %v716_v48  ;;  %v656_v2 = vmax.f32 %v619_v55, 0.0  ;;  %v622_v11 = vpop.f32.mrb[6].mxu0  ;;  %v646_v1 = vpop.f32.mrb[6].mxu1  ;;  %v664_v27 = vmax.f32 %v643_v18, 0.0  ;;  %v726_v32 = vmul.f32 %v703_v22, %v662_v23 }
 0x1f3   :  { %v719_v3 = vmul.f32 %v688_v24, %v655_v61  ;;  %v623_v5 = vadd.f32 %v622_v11, %v516_v45  ;;  %v624_v13 = vpop.f32.mrb[7].mxu0  ;;  %v648_v6 = vpop.f32.mrb[7].mxu1  ;;  %v647_v53 = vadd.f32 %v646_v1, %v536_v16  ;;  %v727_v35 = vmul.f32 %v708_v31, %v663_v26 }
 0x1f4   :  { %v720_v9 = vmul.f32 %v688_v24, %v656_v2  ;;  %v625_v14 = vadd.f32 %v624_v13, %v516_v45  ;;  %v649_v54 = vadd.f32 %v648_v6, %v536_v16  ;;  %v724_v45 = vmul.f32 %v698_v59, %v660_v17  ;;  %v713_v8 = vpop.permute.xlu1 %712 }
 0x1f5   :  { %v732_v57 = vadd.f32 %v731_v51, %v719_v3  ;;  %v657_v47 = vmax.f32 %v623_v5, 0.0  ;;  %v665_v0 = vmax.f32 %v647_v53, 0.0  ;;  %v728_v37 = vmul.f32 %v708_v31, %v664_v27 }
 0x1f6   :  { %v745_v46 = vadd.f32 %v744_v63, %v720_v9  ;;  %v658_v19 = vmax.f32 %v625_v14, 0.0  ;;  %v666_v34 = vmax.f32 %v649_v54, 0.0  ;;  %v765_v51 = vunpack.c.l.s4 %v896_v60 }
 0x1f7   :  { %v721_v21 = vmul.f32 %v693_v29, %v657_v47  ;;  %v758_v11 = vstv %s1289_s6 }
 0x1f8   :  { %v722_v25 = vmul.f32 %v693_v29, %v658_v19  ;;  %v729_v29 = vmul.f32 %v713_v8, %v665_v0  ;;  %v730_v58 = vmul.f32 %v713_v8, %v666_v34  ;;  %v766_v1 = vunpack.c.0.s8 %v765_v51 }
 0x1f9   :  { %v733_v24 = vadd.f32 %v732_v57, %v721_v21 }
 0x1fa   :  { %v746_v44 = vadd.f32 %v745_v46, %v722_v25  ;;  %v769_v6 = vsub.s32 %v766_v1, %v1108_v56 }
 0x1fb   :  { %v734_v30 = vadd.f32 %v733_v24, %v723_v15 }
 0x1fc   :  { %v747_v33 = vadd.f32 %v746_v44, %v724_v45 }
 0x1fd   :  { %v735_v36 = vadd.f32 %v734_v30, %v725_v28 }
 0x1fe   :  { %v748_v38 = vadd.f32 %v747_v33, %v726_v32 }
 0x1ff   :  { %v736_v39 = vadd.f32 %v735_v36, %v727_v35 }
 0x200   :  { %v749_v41 = vadd.f32 %v748_v38, %v728_v37 }
 0x201   :  { %v737_v49 = vadd.f32 %v736_v39, %v729_v29 }
 0x202   :  { %v750_v42 = vadd.f32 %v749_v41, %v730_v58 }
 0x203   :  { %v738_v43 = vrot.slane %v737_v49, 4 }
 0x204   :  { %v751_v40 = vrot.slane %v750_v42, 4 }
 0x205   :  { %v739_v48 = vadd.f32 %v738_v43, %v737_v49 }
 0x206   :  { %v752_v50 = vadd.f32 %v751_v40, %v750_v42 }
 0x207   :  { %v740_v55 = vrot.slane %v739_v48, 2 }
 0x208   :  { %v753_v59 = vrot.slane %v752_v50, 2 }
 0x209   :  { %v741_v61 = vadd.f32 %v740_v55, %v739_v48 }
 0x20a   :  { %v754_v62 = vadd.f32 %v753_v59, %v752_v50 }
 0x20b   :  { %v742_v63 = vrot.slane %v741_v61, 1 }
 0x20c   :  { %v755_v2 = vrot.slane %v754_v62, 1 }
 0x20d   :  { %v743_v12 = vadd.f32 %v742_v63, %v741_v61 }
 0x20e   :  { %v756_v3 = vadd.f32 %v755_v2, %v754_v62 }
 0x20f   :  { %v759_v5 = vadd.f32 %v758_v11, %v743_v12 }
 0x210   :  { %v760_v13 = vadd.f32 %v758_v11, %v756_v3 }
 0x212   :  { %v763_v7 = vcombine.low %v759_v5, %v760_v13 }
 0x214   :  { %v770_v9 = vrot.slane %v763_v7, %v769_v6 }
 0x216   :  { %v777_v14 = vrot.slane %v770_v9, %v769_v6 }
 0x218   :  { %783 = vst.msk [vmem:[#allocation3] sm:$0x3] %vm781_vm0, %v777_v14 }
 0x219   :  { %880 = shalt.err (!%p877_p4)
}
 0x21a   :  { %s881_s20 = scalar_lea.hbm %s1290_s7, 32 }
 0x21b   :  { %p882_p5 = scmp.ne.s32.totalorder %s1290_s7, %s881_s20  ;;  %p885_p6 = scmp.lt.u32.totalorder %s881_s20, %s1290_s7 }
 0x21d   :  { %p887_p7 = pnand %p885_p6, %p882_p5 }
 0x21f   :  { %890 = shalt.err (!%p887_p7)
}
 0x220   :  { %793 = dma.vmem_to_hbm [thread:$0]  %s791_s17, 32, %s1290_s7, [#allocation4]  }
 0x221   :  { %891 = dma.done.wait [#allocation4], 32  }
 0x222   :  { %892 = vsyncadd [#allocation4], 4294967264 }
 0x223   :  { %797 = vsyncpa [#allocation4], 1 }

</bundles_post_ra>
